<compile_context>
chip_gen: v7x
topology: tpu7x:2x2x1
jax: 0.10.0
libtpu: 0.0.40
codegen_flags: <defaults>
</compile_context>

<pallas_src>
import jax
import jax.numpy as jnp
from jax.experimental import pallas as pl
from jax.experimental.pallas import tpu as pltpu


# ---------------------------------------------------------------------------
# Pallas kernel: one batch tile of the fused 3-layer MLP forward
# (normalization already folded into W1/b1; output kept at natural width)
# ---------------------------------------------------------------------------
def actor_ppo_kernel(state_ref,
                     w1_ref, b1_ref, w2_ref, b2_ref, w3_ref, b3_ref,
                     out_ref):
    x = state_ref[...]

    h = jnp.dot(x, w1_ref[...], preferred_element_type=jnp.float32) + b1_ref[...]
    h = jnp.maximum(h, 0.0)

    h = jnp.dot(h, w2_ref[...], preferred_element_type=jnp.float32) + b2_ref[...]
    h = jnp.maximum(h, 0.0)

    h = jnp.dot(h, w3_ref[...], preferred_element_type=jnp.float32) + b3_ref[...]
    out_ref[...] = jnp.tanh(h)


def _cdiv(a, b):
    return -(-a // b)


def _round_up(x, m):
    return ((x + m - 1) // m) * m


def fold_state_norm(params, state_avg, state_std, eps=1e-6):
    """One-time fold of (x - avg)/std into layer-1 weights/bias (host-side)."""
    (w1, b1) = params[0]
    inv_std = 1.0 / jnp.maximum(state_std.reshape(-1).astype(jnp.float32), eps)
    avg = state_avg.reshape(-1).astype(jnp.float32)
    w1f = inv_std[:, None] * w1
    b1f = b1 - (avg * inv_std)[None, :] @ w1
    return [(w1f, b1f), *params[1:]]


def _choose_tiling(B, tile_b):
    """Pick (tile rows, grid length): tile rows are a multiple of 8 (f32
    sublane), and the grid length is even when >1 so v7x's two TensorCores
    split a 'parallel' batch axis evenly."""
    n = max(1, _cdiv(B, tile_b))
    if n > 1 and n % 2:
        n += 1
    tb = _round_up(_cdiv(B, n), 8)
    return tb, n


def actor_ppo_forward(state, folded_params, *, tile_b=2048):
    """folded_params: [(W1', b1'), (W2, b2), (W3, b3)] with W of shape (in, out),
    b of shape (1, out); normalization already folded into (W1', b1')."""
    (w1, b1), (w2, b2), (w3, b3) = folded_params
    B, state_dim = state.shape
    h1, h2 = w1.shape[1], w2.shape[1]
    action_dim = w3.shape[1]

    # ---- batch tiling; padding is at most a handful of rows ----
    tb, n_tiles = _choose_tiling(B, tile_b)
    b_pad = tb * n_tiles
    if b_pad != B:
        state = jnp.pad(state, ((0, b_pad - B), (0, 0)))

    # Weights/biases stay VMEM-resident across the whole grid (constant index map).
    resident = lambda a: pl.BlockSpec(a.shape, lambda i: (0,) * a.ndim)

    # Advisory cost estimate for XLA's scheduler around the custom call.
    flops = 2 * b_pad * (state_dim * h1 + h1 * h2 + h2 * action_dim)
    bytes_accessed = (b_pad * (state_dim + action_dim) * 4
                      + sum(int(a.size) * 4 for a in (w1, b1, w2, b2, w3, b3)))
    cost = pl.CostEstimate(flops=flops,
                           transcendentals=b_pad * action_dim,
                           bytes_accessed=bytes_accessed)

    # VMEM budget (lane-padded): state tile and output tile each occupy
    # tb*128*4 B in VMEM; double-buffered + intermediates ~6-8 MiB at tb=2048,
    # comfortably under the 32 MiB limit set here (safe on v5e/v6e/v7x).
    out = pl.pallas_call(
        actor_ppo_kernel,
        out_shape=jax.ShapeDtypeStruct((b_pad, action_dim), jnp.float32),
        grid=(n_tiles,),
        in_specs=[
            pl.BlockSpec((tb, state_dim), lambda i: (i, 0)),   # state: batch-tiled
            resident(w1), resident(b1),
            resident(w2), resident(b2),
            resident(w3), resident(b3),
        ],
        out_specs=pl.BlockSpec((tb, action_dim), lambda i: (i, 0)),
        compiler_params=pltpu.CompilerParams(
            dimension_semantics=("parallel",),                  # megacore on v7x
            vmem_limit_bytes=32 * 1024 * 1024),
        cost_estimate=cost,
    )(state, w1, b1, w2, b2, w3, b3)

    if b_pad != B:
        out = out[:B]
    return out


# ---------------------------------------------------------------------------
# Deterministic parameter construction (mirrors the PyTorch __init__ shapes)
# ---------------------------------------------------------------------------
def _orthogonal(key, rows, cols, gain):
    # torch.nn.init.orthogonal_ equivalent (semi-orthogonal matrix scaled by gain).
    # Deliberate deviation: sign(0) -> 1 so a zero diag(r) never zeroes a column.
    n = max(rows, cols)
    a = jax.random.normal(key, (n, min(rows, cols)), dtype=jnp.float32)
    q, r = jnp.linalg.qr(a)
    s = jnp.sign(jnp.diag(r))
    s = jnp.where(s == 0, 1.0, s)
    q = q * s[None, :]
    q = q[:n, :]
    if rows < cols:
        q = q.T
    return gain * q[:rows, :cols]


def make_params(key, state_dim, hidden_dims, action_dim):
    dims = [state_dim, *hidden_dims, action_dim]
    params = []
    keys = jax.random.split(key, len(dims) - 1)
    for i in range(len(dims) - 1):
        d_in, d_out = dims[i], dims[i + 1]
        if i == len(dims) - 2:
            # last layer: orthogonal init std=0.1, bias const 1e-6
            w = _orthogonal(keys[i], d_in, d_out, gain=0.1)
            b = jnp.full((1, d_out), 1e-6, dtype=jnp.float32)
        else:
            # hidden layers: deterministic scaled-normal init (synthetic)
            w = (jax.random.normal(keys[i], (d_in, d_out), dtype=jnp.float32)
                 / jnp.sqrt(jnp.float32(d_in)))
            b = jnp.zeros((1, d_out), dtype=jnp.float32)
        params.append((w, b))
    return params


# ---------------------------------------------------------------------------
def _reference_forward(state, state_avg, state_std, params, eps=1e-6):
    x = (state - state_avg.reshape(1, -1)) / jnp.maximum(state_std.reshape(1, -1), eps)
    (w1, b1), (w2, b2), (w3, b3) = params
    h = jnp.maximum(x @ w1 + b1, 0.0)
    h = jnp.maximum(h @ w2 + b2, 0.0)
    return jnp.tanh(h @ w3 + b3)


if __name__ == "__main__":
    state_dim = 16
    hidden_dims = (32, 32)
    action_dim = 8

    key = jax.random.PRNGKey(0)
    k_state1, k_state2, k_params = jax.random.split(key, 3)

    # state_avg = zeros, state_std = ones (as in ActorBase.__init__)
    state_avg = jnp.zeros((state_dim,), dtype=jnp.float32)
    state_std = jnp.ones((state_dim,), dtype=jnp.float32)

    params = make_params(k_params, state_dim, hidden_dims, action_dim)
    folded = fold_state_norm(params, state_avg, state_std)   # one-time transform

    # Case 1: tiny batch (padded to 8 rows internally, single grid step)
    state_small = jax.random.normal(k_state1, (2, state_dim), dtype=jnp.float32)
    out_small = jax.block_until_ready(actor_ppo_forward(state_small, folded))
    ref_small = _reference_forward(state_small, state_avg, state_std, params)
    assert out_small.shape == (2, action_dim)
    assert jnp.allclose(out_small, ref_small, atol=1e-5, rtol=1e-5), \
        "kernel mismatch vs reference (small batch)"

    # Case 2: multi-tile batch exercising the even-length parallel grid
    # (B=600, tile_b=256 -> 4 tiles of 152 rows, 8 rows of batch padding)
    state_big = jax.random.normal(k_state2, (600, state_dim), dtype=jnp.float32)
    out_big = jax.block_until_ready(actor_ppo_forward(state_big, folded, tile_b=256))
    ref_big = _reference_forward(state_big, state_avg, state_std, params)
    assert out_big.shape == (600, action_dim)
    assert jnp.allclose(out_big, ref_big, atol=1e-5, rtol=1e-5), \
        "kernel mismatch vs reference (tiled batch)"

    # TODO(synk): get_action / get_logprob_entropy use torch.distributions sampling;
    # only the deterministic forward() hot path is implemented here.
    print("KERNEL_OK")
</pallas_src>

<mosaic_0001>
module attributes {stable_mosaic.version = 11 : i64} {
  func.func @actor_ppo_kernel(%arg0: i32, %arg1: memref<8x16xf32, #tpu.memory_space<vmem>>, %arg2: memref<16x32xf32, #tpu.memory_space<vmem>>, %arg3: memref<1x32xf32, #tpu.memory_space<vmem>>, %arg4: memref<32x32xf32, #tpu.memory_space<vmem>>, %arg5: memref<1x32xf32, #tpu.memory_space<vmem>>, %arg6: memref<32x8xf32, #tpu.memory_space<vmem>>, %arg7: memref<1x8xf32, #tpu.memory_space<vmem>>, %arg8: memref<8x8xf32, #tpu.memory_space<vmem>>) attributes {dimension_semantics = [#tpu.dimension_semantics<parallel>], iteration_bounds = array<i64: 1>, scalar_prefetch = 0 : i64, scratch_operands = 0 : i64, tpu.core_type = #tpu.core_type<tc>, window_params = [{transform_indices = @transform_0, window_bounds = array<i64: 8, 16>}, {pipeline_mode = #tpu.pipeline_mode<synchronous>, transform_indices = @transform_1, window_bounds = array<i64: 16, 32>}, {pipeline_mode = #tpu.pipeline_mode<synchronous>, transform_indices = @transform_2, window_bounds = array<i64: 1, 32>}, {pipeline_mode = #tpu.pipeline_mode<synchronous>, transform_indices = @transform_3, window_bounds = array<i64: 32, 32>}, {pipeline_mode = #tpu.pipeline_mode<synchronous>, transform_indices = @transform_4, window_bounds = array<i64: 1, 32>}, {pipeline_mode = #tpu.pipeline_mode<synchronous>, transform_indices = @transform_5, window_bounds = array<i64: 32, 8>}, {pipeline_mode = #tpu.pipeline_mode<synchronous>, transform_indices = @transform_6, window_bounds = array<i64: 1, 8>}, {transform_indices = @transform_7, window_bounds = array<i64: 8, 8>}]} {
    %c0 = arith.constant 0 : index
    %c0_0 = arith.constant 0 : index
    %0 = vector.load %arg1[%c0, %c0_0] : memref<8x16xf32, #tpu.memory_space<vmem>>, vector<8x16xf32>
    %c0_1 = arith.constant 0 : index
    %c0_2 = arith.constant 0 : index
    %1 = vector.load %arg2[%c0_1, %c0_2] : memref<16x32xf32, #tpu.memory_space<vmem>>, vector<16x32xf32>
    %cst = arith.constant dense<0.000000e+00> : vector<8x32xf32>
    %2 = tpu.matmul %0, %1, %cst {dimension_numbers = #tpu.dot_dimension_numbers<[1], [0], [0], [1], [0, 0, 1, 1], [], []>} : vector<8x16xf32>, vector<16x32xf32>, vector<8x32xf32> -> vector<8x32xf32>
    %c0_3 = arith.constant 0 : index
    %c0_4 = arith.constant 0 : index
    %3 = vector.load %arg3[%c0_3, %c0_4] : memref<1x32xf32, #tpu.memory_space<vmem>>, vector<1x32xf32>
    %4 = vector.broadcast %3 : vector<1x32xf32> to vector<8x32xf32>
    %5 = arith.addf %2, %4 : vector<8x32xf32>
    %cst_5 = arith.constant 0.000000e+00 : f32
    %6 = vector.broadcast %cst_5 : f32 to vector<8x32xf32>
    %7 = arith.maximumf %5, %6 : vector<8x32xf32>
    %c0_6 = arith.constant 0 : index
    %c0_7 = arith.constant 0 : index
    %8 = vector.load %arg4[%c0_6, %c0_7] : memref<32x32xf32, #tpu.memory_space<vmem>>, vector<32x32xf32>
    %cst_8 = arith.constant dense<0.000000e+00> : vector<8x32xf32>
    %9 = tpu.matmul %7, %8, %cst_8 {dimension_numbers = #tpu.dot_dimension_numbers<[1], [0], [0], [1], [0, 0, 1, 1], [], []>} : vector<8x32xf32>, vector<32x32xf32>, vector<8x32xf32> -> vector<8x32xf32>
    %c0_9 = arith.constant 0 : index
    %c0_10 = arith.constant 0 : index
    %10 = vector.load %arg5[%c0_9, %c0_10] : memref<1x32xf32, #tpu.memory_space<vmem>>, vector<1x32xf32>
    %11 = vector.broadcast %10 : vector<1x32xf32> to vector<8x32xf32>
    %12 = arith.addf %9, %11 : vector<8x32xf32>
    %cst_11 = arith.constant 0.000000e+00 : f32
    %13 = vector.broadcast %cst_11 : f32 to vector<8x32xf32>
    %14 = arith.maximumf %12, %13 : vector<8x32xf32>
    %c0_12 = arith.constant 0 : index
    %c0_13 = arith.constant 0 : index
    %15 = vector.load %arg6[%c0_12, %c0_13] : memref<32x8xf32, #tpu.memory_space<vmem>>, vector<32x8xf32>
    %cst_14 = arith.constant dense<0.000000e+00> : vector<8x8xf32>
    %16 = tpu.matmul %14, %15, %cst_14 {dimension_numbers = #tpu.dot_dimension_numbers<[1], [0], [0], [1], [0, 0, 1, 1], [], []>} : vector<8x32xf32>, vector<32x8xf32>, vector<8x8xf32> -> vector<8x8xf32>
    %c0_15 = arith.constant 0 : index
    %c0_16 = arith.constant 0 : index
    %17 = vector.load %arg7[%c0_15, %c0_16] : memref<1x8xf32, #tpu.memory_space<vmem>>, vector<1x8xf32>
    %18 = vector.broadcast %17 : vector<1x8xf32> to vector<8x8xf32>
    %19 = arith.addf %16, %18 : vector<8x8xf32>
    %20 = math.tanh %19 : vector<8x8xf32>
    %c0_17 = arith.constant 0 : index
    %c0_18 = arith.constant 0 : index
    %21 = vector.load %arg8[%c0_17, %c0_18] : memref<8x8xf32, #tpu.memory_space<vmem>>, vector<8x8xf32>
    tpu.vector_store %arg8[%c0_17, %c0_18], %20 {strides = array<i32>} : memref<8x8xf32, #tpu.memory_space<vmem>>, vector<8x8xf32>,
    return
  }
  func.func @transform_0(%arg0: i32) -> (i32, i32) {
    %c0_i32 = arith.constant 0 : i32
    %c0_i32_0 = arith.constant 0 : i32
    return %arg0, %c0_i32 : i32, i32
  }
  func.func @transform_1(%arg0: i32) -> (i32, i32) {
    %c0_i32 = arith.constant 0 : i32
    %c0_i32_0 = arith.constant 0 : i32
    %c0_i32_1 = arith.constant 0 : i32
    return %c0_i32, %c0_i32_0 : i32, i32
  }
  func.func @transform_2(%arg0: i32) -> (i32, i32) {
    %c0_i32 = arith.constant 0 : i32
    %c0_i32_0 = arith.constant 0 : i32
    %c0_i32_1 = arith.constant 0 : i32
    return %c0_i32, %c0_i32_0 : i32, i32
  }
  func.func @transform_3(%arg0: i32) -> (i32, i32) {
    %c0_i32 = arith.constant 0 : i32
    %c0_i32_0 = arith.constant 0 : i32
    %c0_i32_1 = arith.constant 0 : i32
    return %c0_i32, %c0_i32_0 : i32, i32
  }
  func.func @transform_4(%arg0: i32) -> (i32, i32) {
    %c0_i32 = arith.constant 0 : i32
    %c0_i32_0 = arith.constant 0 : i32
    %c0_i32_1 = arith.constant 0 : i32
    return %c0_i32, %c0_i32_0 : i32, i32
  }
  func.func @transform_5(%arg0: i32) -> (i32, i32) {
    %c0_i32 = arith.constant 0 : i32
    %c0_i32_0 = arith.constant 0 : i32
    %c0_i32_1 = arith.constant 0 : i32
    return %c0_i32, %c0_i32_0 : i32, i32
  }
  func.func @transform_6(%arg0: i32) -> (i32, i32) {
    %c0_i32 = arith.constant 0 : i32
    %c0_i32_0 = arith.constant 0 : i32
    %c0_i32_1 = arith.constant 0 : i32
    return %c0_i32, %c0_i32_0 : i32, i32
  }
  func.func @transform_7(%arg0: i32) -> (i32, i32) {
    %c0_i32 = arith.constant 0 : i32
    %c0_i32_0 = arith.constant 0 : i32
    return %arg0, %c0_i32 : i32, i32
  }
}

</mosaic_0001>

<bundles_post_ra>
// kernel: tpu_custom_call.1
= control target key start
LH: loop header
LB: loop body
LE: loop exit
PB: predicated region body
PF: predicated region fallthrough
CT: control target
= control target key end

     0   :  { %12 = vsyncpa [#allocation3], 0  ;;  %s541_s0 = inlined_call_operand.hbm [shape: f32[8,16], index: 0, kind: input, shape index: {}]   ;;  %s542_s1 = inlined_call_operand.vmem [shape: f32[16,32], index: 1, kind: input, shape index: {}]   ;;  %s543_s2 = inlined_call_operand.vmem [shape: f32[1,32], index: 2, kind: input, shape index: {}]   ;;  %s544_s3 = inlined_call_operand.vmem [shape: f32[32,32], index: 3, kind: input, shape index: {}]   ;;  %s545_s4 = inlined_call_operand.vmem [shape: f32[1,32], index: 4, kind: input, shape index: {}]   ;;  %s546_s5 = inlined_call_operand.vmem [shape: f32[32,8], index: 5, kind: input, shape index: {}]   ;;  %s547_s6 = inlined_call_operand.vmem [shape: f32[1,8], index: 6, kind: input, shape index: {}]   ;;  %s548_s7 = inlined_call_operand.hbm [shape: f32[8,8], index: 7, kind: output, shape index: {}]  }
   0x1   :  { %13 = vsyncpa [#allocation4], 0  ;;  %s430_s24 = smov [#allocation2]   ;;  %s382_s28 = scalar_lea.hbm %s541_s0, 128 }
   0x2   :  { %s20_s25 = sshll.u32 %s430_s24, 4  ;;  %p383_p0 = scmp.ne.s32.totalorder %s541_s0, %s382_s28  ;;  %s21_s25 = int_to_ptr.vmem [resolvable:$true] %s20_s25 }
   0x3   :  { %p386_p1 = scmp.lt.u32.totalorder %s382_s28, %s541_s0 }
   0x5   :  { %p388_p2 = pnand %p386_p1, %p383_p0 }
   0x7   :  { %391 = shalt.err (!%p388_p2)
}
   0x8   :  { %s392_s10 = scalar_lea.vmem %s21_s25, 128  ;;  %p397_p4 = scmp.lt.s32.totalorder %s21_s25, %s21_s25 }
   0x9   :  { %p393_p3 = scmp.ne.s32.totalorder %s21_s25, %s392_s10  ;;  %p398_p5 = scmp.lt.s32.totalorder %s392_s10, %s392_s10 }
   0xb   :  { %p399_p6 = por %p398_p5, %p397_p4 }
   0xd   :  { %p400_p7 = pnand %p399_p6, %p393_p3 }
   0xf   :  { %403 = shalt.err (!%p400_p7)
}
  0x10   :  { %23 = dma.hbm_to_vmem [thread:$0]  %s541_s0, 128, %s21_s25, [#allocation3]  }
  0x11   :  { %426 = dma.done.wait [#allocation3], 128  }
  0x12   :  { %427 = vsyncadd [#allocation3], 4294967168  ;;  %v431_v0 = vmov 0.0|0.0   ;;  %vm432_vm0 = vmmov 0   ;;  %v433_v1 = vmov 0.0   ;;  %v40_v2 = vld [vmem:[%s542_s1] sm:$0xff] }
  0x13   :  { %360 = vmatprep.subr.bf16.mxu0 %v431_v0  ;;  %335 = vmatprep.mubr.msk.f32.mxu0 %vm432_vm0, %v433_v1  ;;  %v41_v3 = vld [vmem:[%s542_s1 + $0x8] sm:$0xff]  ;;  %v124_v5 = vld [vmem:[%s544_s3] sm:$0xff]  ;;  %vm49_vm1 = vcmask 130048   ;;  %v126_v9 = vld [vmem:[%s544_s3 + $0x10] sm:$0xff]  ;;  %vm135_vm2 = vcmask 261120   ;;  %vm295_vm3 = vcmask 64512  }
  0x14   :  { %363 = vmatprep.subr.bf16.mxu1 %v431_v0  ;;  %346 = vmatprep.mubr.msk.f32.mxu1 %vm432_vm0, %v433_v1  ;;  %v361_v4 = vpack.c.bf16 %v41_v3, %v40_v2  ;;  %v125_v6 = vld [vmem:[%s544_s3 + $0x8] sm:$0xff]  ;;  %v39_v8 = vld [vmem:[#allocation2] sm:$0xff]  ;;  %v127_v10 = vld [vmem:[%s544_s3 + $0x18] sm:$0xff] }
  0x15   :  { %v364_v7 = vpack.c.bf16 %v125_v6, %v124_v5  ;;  %v367_v11 = vpack.c.bf16 %v127_v10, %v126_v9  ;;  %v210_v12 = vld [vmem:[%s546_s5] sm:$0xff]  ;;  %v211_v13 = vld [vmem:[%s546_s5 + $0x8] sm:$0xff]  ;;  %v212_v20 = vld [vmem:[%s546_s5 + $0x10] sm:$0xff] }
  0x16   :  { %362 = vmatpush3.bf16.msra.mxu0 %v361_v4  ;;  %v370_v14 = vpack.c.bf16 %v211_v13, %v210_v12  ;;  %v312_v15 = vld [vmem:[%s543_s2] ss:$0 sm:$0xff]  ;;  %v213_v21 = vld [vmem:[%s546_s5 + $0x18] sm:$0xff]  ;;  %s434_s5 = smov [#allocation5]  }
  0x17   :  { %365 = vmatpush3.bf16.msra.mxu1 %v364_v7  ;;  %369 = vmatprep.subr.bf16.mxu0 %v431_v0  ;;  %v373_v22 = vpack.c.bf16 %v213_v21, %v212_v20  ;;  %v314_v23 = vld [vmem:[%s545_s4] ss:$0 sm:$0xff]  ;;  %s303_s12 = sshll.u32 %s434_s5, 4  ;;  %s304_s12 = int_to_ptr.vmem [resolvable:$true] %s303_s12 }
  0x18   :  { %366 = vmatprep.subr.bf16.mxu1 %v431_v0  ;;  %v316_v28 = vld [vmem:[%s547_s6] ss:$0 sm:$0xff]  ;;  %s404_s4 = scalar_lea.vmem %s304_s12, 128  ;;  %p409_p9 = scmp.lt.s32.totalorder %s304_s12, %s304_s12 }
  0x19   :  { %336 = vmatmul.mubr.msk.f32.vlgmr.msra.gmra.mrb[0].mxu0 %vm49_vm1, %v39_v8  ;;  %p405_p8 = scmp.ne.s32.totalorder %s304_s12, %s404_s4  ;;  %p410_p10 = scmp.lt.s32.totalorder %s404_s4, %s404_s4 }
  0x1a   :  { %357 = vmatprep.mubr.msk.f32.mxu0 %vm432_vm0, %v433_v1  ;;  %371 = vmatpush3.bf16.msra.mxu0 %v370_v14 }
  0x1b   :  { %368 = vmatpush3.bf16.msra.mxu1 %v367_v11  ;;  %372 = vmatprep.subr.bf16.mxu0 %v431_v0  ;;  %p411_p11 = por %p410_p10, %p409_p9 }
  0x1d   :  { %p412_p12 = pnand %p411_p11, %p405_p8 }
  0x1e   :  { %374 = vmatpush3.bf16.msra.mxu0 %v373_v22 }
  0xec   :  { %v119_v16 = vpop.f32.mrb[0].mxu0 }
  0xed   :  { %v120_v17 = vadd.f32 %v312_v15, %v119_v16  ;;  %v337_v18 = vpop.f32.mrb[1].mxu0 }
  0xef   :  { %v123_v19 = vmax.f32 %v120_v17, 0.0 }
  0xf1   :  { %347 = vmatmul.mubr.msk.f32.vlgmr.msra.gmra.mrb[0].mxu1 %vm135_vm2, %v123_v19 }
 0x1c4   :  { %v205_v24 = vpop.f32.mrb[0].mxu1 }
 0x1c5   :  { %v206_v25 = vadd.f32 %v314_v23, %v205_v24  ;;  %v348_v26 = vpop.f32.mrb[1].mxu1 }
 0x1c7   :  { %v209_v27 = vmax.f32 %v206_v25, 0.0 }
 0x1c9   :  { %358 = vmatmul.mubr.msk.f32.vlgmr.msra.gmra.mrb[2].mxu0 %vm135_vm2, %v209_v27 }
 0x29c   :  { %v290_v29 = vpop.f32.mrb[2].mxu0 }
 0x29d   :  { %v291_v30 = vadd.f32 %v316_v28, %v290_v29  ;;  %v359_v31 = vpop.f32.mrb[3].mxu0 }
 0x29f   :  { %380 = vtanh.f32 %v291_v30 }
 0x2a9   :  { %v381_v32 = vpop.eup %380 }
 0x2aa   :  { %296 = vst.msk [vmem:[#allocation5] sm:$0xff] %vm295_vm3, %v381_v32 }
 0x2ab   :  { %415 = shalt.err (!%p412_p12)
}
 0x2ac   :  { %s416_s6 = scalar_lea.hbm %s548_s7, 128 }
 0x2ad   :  { %p417_p13 = scmp.ne.s32.totalorder %s548_s7, %s416_s6  ;;  %p420_p0 = scmp.lt.u32.totalorder %s416_s6, %s548_s7 }
 0x2af   :  { %p422_p1 = pnand %p420_p0, %p417_p13 }
 0x2b1   :  { %425 = shalt.err (!%p422_p1)
}
 0x2b2   :  { %306 = dma.vmem_to_hbm [thread:$0]  %s304_s12, 128, %s548_s7, [#allocation4]  }
 0x2b3   :  { %428 = dma.done.wait [#allocation4], 128  }
 0x2b4   :  { %429 = vsyncadd [#allocation4], 4294967168 }
 0x2b5   :  { %310 = vsyncpa [#allocation3], 1 }
 0x2b6   :  { %311 = vsyncpa [#allocation4], 1 }

</bundles_post_ra>
